<compile_context>
chip_gen: v5e
topology: v5e:2x2
jax: 0.10.0
libtpu: 0.0.40
codegen_flags: <defaults>
</compile_context>

<pallas_src>
import jax
import jax.numpy as jnp
from jax import lax
from jax.experimental import pallas as pl
from jax.experimental.pallas import tpu as pltpu
import numpy as np


# 32 MiB scoped VMEM: safe on v5e/v6e and within v7x's 64 MiB physical VMEM.
_VMEM_LIMIT_BYTES = 32 * 1024 * 1024


def _round_up(x, m):
    return (x + m - 1) // m * m


# ----------------------------------------------------------------------------
# Kernel 1: 2x2 average pooling (stride 2) as ONE lane-dense matmul per tile.
#   y_flat = x_flat @ P   with P[h*W+w, oy*Wo+ox] = 0.25 on the 2x2 window.
# ----------------------------------------------------------------------------
def _avgpool_kernel(x_ref, p_ref, o_ref):
    # x_ref : (TILE_BC, H*W)   p_ref : (H*W, Ho*Wo)   o_ref : (TILE_BC, Ho*Wo)
    o_ref[...] = jnp.dot(x_ref[...], p_ref[...],
                         preferred_element_type=jnp.float32).astype(o_ref.dtype)


def _pool_matrix(n):
    # (n//2, n) with 0.5 at [i, 2i] and [i, 2i+1]
    eye = jnp.eye(n // 2, dtype=jnp.float32)
    return 0.5 * jnp.repeat(eye, 2, axis=1)


def avg_pool_2x2(x, *, tile_bc=512):
    """x: (B, C, H, W) float32 -> (B, C, H//2, W//2)."""
    B, C, H, W = x.shape
    assert H % 2 == 0 and W % 2 == 0
    Ho, Wo = H // 2, W // 2
    BC = B * C

    # Batch many channels per grid step (multiple of 8 sublanes).
    t = min(tile_bc, _round_up(BC, 8))
    BCp = _round_up(BC, t)

    x2 = x.reshape(BC, H * W)                       # free row-major reshape
    if BCp != BC:
        x2 = jnp.pad(x2, ((0, BCp - BC), (0, 0)))

    # P[h*W + w, oy*Wo + ox] = 0.25 iff (h, w) lies in output window (oy, ox).
    # TODO(synk): P holds (H*W)^2/4 floats; for very large feature maps switch
    # to a separable / VPU-add formulation instead of this single matmul.
    P = jnp.kron(_pool_matrix(H).T, _pool_matrix(W).T)   # (H*W, Ho*Wo)

    out = pl.pallas_call(
        _avgpool_kernel,
        out_shape=jax.ShapeDtypeStruct((BCp, Ho * Wo), jnp.float32),
        grid=(BCp // t,),
        in_specs=[
            pl.BlockSpec((t, H * W), lambda i: (i, 0)),
            pl.BlockSpec((H * W, Ho * Wo), lambda i: (0, 0)),   # stays resident
        ],
        out_specs=pl.BlockSpec((t, Ho * Wo), lambda i: (i, 0)),
        compiler_params=pltpu.CompilerParams(
            dimension_semantics=("parallel",),
            vmem_limit_bytes=_VMEM_LIMIT_BYTES),
    )(x2, P)
    return out[:BC].reshape(B, C, Ho, Wo)


# ----------------------------------------------------------------------------
# Kernel 2: conv3x3, stride 2, padding 1, with bias — im2col fused in-kernel.
#   Wrapper: pad + split padded rows/cols into even/odd phases (layout only).
#   Kernel : assemble the (9C, Ho*Wo) patch matrix in a VMEM scratch from the
#            4 phase images (static slices), one MXU matmul, bias at the end.
# ----------------------------------------------------------------------------
def _conv3x3_s2_kernel(ph_ref, w_ref, b_ref, o_ref, patch_ref):
    # ph_ref   : (1, 4*C, Ho+1, Wo+1) phase-split padded input (one batch elem)
    #            ph[0, (2*py+px)*C + c, i, j] == x_padded[c, 2*i+py, 2*j+px]
    # w_ref    : (OC, 9*C)   row index = (ky*3+kx)*C + c
    # b_ref    : (OC, 1)
    # o_ref    : (1, OC, Ho*Wo)   lane-dense flattened output
    # patch_ref: (9*C, Ho*Wo) VMEM scratch (fused im2col buffer)
    C = w_ref.shape[1] // 9
    Ho = ph_ref.shape[2] - 1
    Wo = ph_ref.shape[3] - 1

    # Fused im2col: every tap (ky, kx) is a static (C, Ho, Wo) window of one of
    # the four phase images; flatten it row-by-row into the patch buffer.
    for ky in range(3):
        for kx in range(3):
            tap = ky * 3 + kx
            p = (ky % 2) * 2 + (kx % 2)       # which phase image
            dy, dx = ky // 2, kx // 2         # shift inside that phase
            for oy in range(Ho):
                patch_ref[tap * C:(tap + 1) * C, oy * Wo:(oy + 1) * Wo] = (
                    ph_ref[0, p * C:(p + 1) * C, oy + dy, dx:dx + Wo])

    acc = jnp.dot(w_ref[...], patch_ref[...], preferred_element_type=jnp.float32)
    o_ref[0] = (acc + b_ref[...]).astype(o_ref.dtype)


def conv3x3_stride2(x, w, b):
    """x: (B,C,H,W), w: (OC,C,3,3), b: (OC,) -> (B,OC,H//2,W//2)."""
    B, C, H, W = x.shape
    OC = w.shape[0]
    assert H % 2 == 0 and W % 2 == 0
    Ho, Wo = H // 2, W // 2
    N = Ho * Wo

    # Layout plumbing only (~1x traffic, vs 9x for materialized im2col):
    # pad, then split padded rows/cols into even/odd phases so every conv tap
    # becomes a static slice of one phase image inside the kernel.
    xp = jnp.pad(x, ((0, 0), (0, 0), (1, 1), (1, 1)))         # (B,C,2Ho+2,2Wo+2)
    ph = xp.reshape(B, C, Ho + 1, 2, Wo + 1, 2)
    ph = ph.transpose(0, 3, 5, 1, 2, 4).reshape(B, 4 * C, Ho + 1, Wo + 1)

    w2 = w.transpose(0, 2, 3, 1).reshape(OC, 9 * C)           # [oc, (ky*3+kx)*C + c]
    b2 = b.reshape(OC, 1)

    # TODO(synk): for large C / feature maps, add grid axes over N (=Ho*Wo,
    # 128-multiple tiles, "parallel") and K (=9*C, f32 acc scratch with pl.when
    # init/finalize, bias only in the finalize step); at these sizes one
    # (9C, N) block per batch element fits comfortably in the 32 MiB budget.
    out = pl.pallas_call(
        _conv3x3_s2_kernel,
        out_shape=jax.ShapeDtypeStruct((B, OC, N), jnp.float32),
        grid=(B,),
        in_specs=[
            pl.BlockSpec((1, 4 * C, Ho + 1, Wo + 1), lambda i: (i, 0, 0, 0)),
            pl.BlockSpec((OC, 9 * C), lambda i: (0, 0)),
            pl.BlockSpec((OC, 1), lambda i: (0, 0)),
        ],
        out_specs=pl.BlockSpec((1, OC, N), lambda i: (i, 0, 0)),
        scratch_shapes=[pltpu.VMEM((9 * C, N), jnp.float32)],
        compiler_params=pltpu.CompilerParams(
            dimension_semantics=("parallel",),
            vmem_limit_bytes=_VMEM_LIMIT_BYTES),
    )(ph, w2, b2)
    return out.reshape(B, OC, Ho, Wo)


# ----------------------------------------------------------------------------
# Downsample module equivalent (fir=False paths).
# ----------------------------------------------------------------------------
def downsample_forward(x, *, out_ch=None, with_conv=False, fir=False,
                       conv_w=None, conv_b=None):
    B, C, H, W = x.shape
    oc = out_ch if out_ch else C
    if fir:
        # TODO(synk): fir=True reference branches are not runnable as written; skipped.
        raise NotImplementedError("fir=True branch not implemented")
    if with_conv:
        y = conv3x3_stride2(x, conv_w, conv_b)
    else:
        y = avg_pool_2x2(x)
    assert y.shape == (B, oc, H // 2, W // 2)
    return y


if __name__ == "__main__":
    key = jax.random.PRNGKey(0)
    kx, kw, kb = jax.random.split(key, 3)

    B, C, H, W = 2, 4, 16, 16
    out_ch = 4
    x = jax.random.normal(kx, (B, C, H, W), dtype=jnp.float32)

    # Deterministic conv3x3 parameters (nn.Conv2d(C, out_ch, 3, stride=2, padding=1)).
    conv_w = 0.1 * jax.random.normal(kw, (out_ch, C, 3, 3), dtype=jnp.float32)
    conv_b = 0.1 * jax.random.normal(kb, (out_ch,), dtype=jnp.float32)

    # --- branch 1: default Downsample (with_conv=False, fir=False) -> avg_pool2d(2,2)
    y_pool = downsample_forward(x, with_conv=False)
    y_pool = jax.block_until_ready(y_pool)
    ref_pool = x.reshape(B, C, H // 2, 2, W // 2, 2).mean(axis=(3, 5))
    np.testing.assert_allclose(np.asarray(y_pool), np.asarray(ref_pool),
                               rtol=1e-5, atol=1e-5)

    # --- branch 2: Downsample(with_conv=True) -> conv3x3 stride 2
    y_conv = downsample_forward(x, out_ch=out_ch, with_conv=True,
                                conv_w=conv_w, conv_b=conv_b)
    y_conv = jax.block_until_ready(y_conv)
    ref_conv = lax.conv_general_dilated(
        x, conv_w, window_strides=(2, 2), padding=((1, 1), (1, 1)),
        dimension_numbers=("NCHW", "OIHW", "NCHW"),
    ) + conv_b[None, :, None, None]
    np.testing.assert_allclose(np.asarray(y_conv), np.asarray(ref_conv),
                               rtol=1e-4, atol=1e-4)

    print("KERNEL_OK")
</pallas_src>

<mosaic_0001>
module attributes {stable_mosaic.version = 11 : i64} {
  func.func @_avgpool_kernel(%arg0: i32, %arg1: memref<8x256xf32, #tpu.memory_space<vmem>>, %arg2: memref<256x64xf32, #tpu.memory_space<vmem>>, %arg3: memref<8x64xf32, #tpu.memory_space<vmem>>) attributes {dimension_semantics = [#tpu.dimension_semantics<parallel>], iteration_bounds = array<i64: 1>, scalar_prefetch = 0 : i64, scratch_operands = 0 : i64, tpu.core_type = #tpu.core_type<tc>, window_params = [{transform_indices = @transform_0, window_bounds = array<i64: 8, 256>}, {pipeline_mode = #tpu.pipeline_mode<synchronous>, transform_indices = @transform_1, window_bounds = array<i64: 256, 64>}, {transform_indices = @transform_2, window_bounds = array<i64: 8, 64>}]} {
    %c0 = arith.constant 0 : index
    %c0_0 = arith.constant 0 : index
    %0 = vector.load %arg1[%c0, %c0_0] : memref<8x256xf32, #tpu.memory_space<vmem>>, vector<8x256xf32>
    %c0_1 = arith.constant 0 : index
    %c0_2 = arith.constant 0 : index
    %1 = vector.load %arg2[%c0_1, %c0_2] : memref<256x64xf32, #tpu.memory_space<vmem>>, vector<256x64xf32>
    %cst = arith.constant dense<0.000000e+00> : vector<8x64xf32>
    %2 = tpu.matmul %0, %1, %cst {dimension_numbers = #tpu.dot_dimension_numbers<[1], [0], [0], [1], [0, 0, 1, 1], [], []>} : vector<8x256xf32>, vector<256x64xf32>, vector<8x64xf32> -> vector<8x64xf32>
    %c0_3 = arith.constant 0 : index
    %c0_4 = arith.constant 0 : index
    %3 = vector.load %arg3[%c0_3, %c0_4] : memref<8x64xf32, #tpu.memory_space<vmem>>, vector<8x64xf32>
    tpu.vector_store %arg3[%c0_3, %c0_4], %2 {strides = array<i32>} : memref<8x64xf32, #tpu.memory_space<vmem>>, vector<8x64xf32>,
    return
  }
  func.func @transform_0(%arg0: i32) -> (i32, i32) {
    %c0_i32 = arith.constant 0 : i32
    %c0_i32_0 = arith.constant 0 : i32
    return %arg0, %c0_i32 : i32, i32
  }
  func.func @transform_1(%arg0: i32) -> (i32, i32) {
    %c0_i32 = arith.constant 0 : i32
    %c0_i32_0 = arith.constant 0 : i32
    %c0_i32_1 = arith.constant 0 : i32
    return %c0_i32, %c0_i32_0 : i32, i32
  }
  func.func @transform_2(%arg0: i32) -> (i32, i32) {
    %c0_i32 = arith.constant 0 : i32
    %c0_i32_0 = arith.constant 0 : i32
    return %arg0, %c0_i32 : i32, i32
  }
}

</mosaic_0001>

<bundles_post_ra>
// kernel: tpu_custom_call.1
= control target key start
LH: loop header
LB: loop body
LE: loop exit
PB: predicated region body
PF: predicated region fallthrough
CT: control target
= control target key end

     0   :  { %s252_s0 = inlined_call_operand.vmem [shape: f32[8,256], index: 0, kind: input, shape index: {}]   ;;  %s253_s1 = inlined_call_operand.vmem [shape: f32[256,64], index: 1, kind: input, shape index: {}]   ;;  %s254_s2 = inlined_call_operand.hbm [shape: f32[8,64], index: 2, kind: output, shape index: {}]  }
   0x1   :  { %v29_v0 = vld [vmem:[%s253_s1 + $0x78] sm:$0xff]  ;;  %v28_v2 = vld [vmem:[%s253_s1 + $0x70] sm:$0xff]  ;;  %v27_v4 = vld [vmem:[%s253_s1 + $0x68] sm:$0xff] }
   0x2   :  { %v45_v1 = vld [vmem:[%s253_s1 + $0xf8] sm:$0xff]  ;;  %46 = vmatpush.msra.mxu0 %v29_v0  ;;  %v44_v3 = vld [vmem:[%s253_s1 + $0xf0] sm:$0xff]  ;;  %v43_v5 = vld [vmem:[%s253_s1 + $0xe8] sm:$0xff] }
   0x3   :  { %66 = vmatpush.msra.mxu1 %v45_v1  ;;  %v26_v6 = vld [vmem:[%s253_s1 + $0x60] sm:$0xff]  ;;  %v25_v8 = vld [vmem:[%s253_s1 + $0x58] sm:$0xff]  ;;  %v24_v10 = vld [vmem:[%s253_s1 + $0x50] sm:$0xff] }
   0x4   :  { %47 = vmatpush.msra.mxu0 %v28_v2  ;;  %v42_v7 = vld [vmem:[%s253_s1 + $0xe0] sm:$0xff]  ;;  %v41_v9 = vld [vmem:[%s253_s1 + $0xd8] sm:$0xff]  ;;  %v40_v11 = vld [vmem:[%s253_s1 + $0xd0] sm:$0xff] }
   0x5   :  { %67 = vmatpush.msra.mxu1 %v44_v3  ;;  %v23_v12 = vld [vmem:[%s253_s1 + $0x48] sm:$0xff] }
   0x6   :  { %48 = vmatpush.msra.mxu0 %v27_v4  ;;  %v39_v13 = vld [vmem:[%s253_s1 + $0xc8] sm:$0xff] }
   0x7   :  { %68 = vmatpush.msra.mxu1 %v43_v5 }
   0x8   :  { %49 = vmatpush.msra.mxu0 %v26_v6 }
   0x9   :  { %69 = vmatpush.msra.mxu1 %v42_v7 }
   0xa   :  { %50 = vmatpush.msra.mxu0 %v25_v8 }
   0xb   :  { %70 = vmatpush.msra.mxu1 %v41_v9 }
   0xc   :  { %51 = vmatpush.msra.mxu0 %v24_v10 }
   0xd   :  { %71 = vmatpush.msra.mxu1 %v40_v11 }
   0xe   :  { %7 = vsyncpa [#allocation3], 0  ;;  %v22_v14 = vld [vmem:[%s253_s1 + $0x40] sm:$0xff]  ;;  %52 = vmatpush.msra.mxu0 %v23_v12  ;;  %v21_v16 = vld [vmem:[%s253_s1 + $0x38] sm:$0xff]  ;;  %s131_s21 = smov [#allocation2]   ;;  %vm86_vm0 = vcmask 523264  }
   0xf   :  { %v38_v15 = vld [vmem:[%s253_s1 + $0xc0] sm:$0xff]  ;;  %72 = vmatpush.msra.mxu1 %v39_v13  ;;  %v37_v17 = vld [vmem:[%s253_s1 + $0xb8] sm:$0xff]  ;;  %v20_v18 = vld [vmem:[%s253_s1 + $0x30] sm:$0xff]  ;;  %s93_s22 = sshll.u32 %s131_s21, 4  ;;  %s94_s22 = int_to_ptr.vmem [resolvable:$true] %s93_s22 }
  0x10   :  { %53 = vmatpush.msra.mxu0 %v22_v14  ;;  %v36_v19 = vld [vmem:[%s253_s1 + $0xb0] sm:$0xff]  ;;  %v19_v20 = vld [vmem:[%s253_s1 + $0x28] sm:$0xff]  ;;  %v18_v22 = vld [vmem:[%s253_s1 + $0x20] sm:$0xff] }
  0x11   :  { %73 = vmatpush.msra.mxu1 %v38_v15  ;;  %v35_v21 = vld [vmem:[%s253_s1 + $0xa8] sm:$0xff]  ;;  %v34_v23 = vld [vmem:[%s253_s1 + $0xa0] sm:$0xff]  ;;  %v17_v24 = vld [vmem:[%s253_s1 + $0x18] sm:$0xff] }
  0x12   :  { %54 = vmatpush.msra.mxu0 %v21_v16  ;;  %v33_v25 = vld [vmem:[%s253_s1 + $0x98] sm:$0xff]  ;;  %v16_v26 = vld [vmem:[%s253_s1 + $0x10] sm:$0xff]  ;;  %v15_v28 = vld [vmem:[%s253_s1 + $0x8] sm:$0xff] }
  0x13   :  { %74 = vmatpush.msra.mxu1 %v37_v17  ;;  %v32_v27 = vld [vmem:[%s253_s1 + $0x90] sm:$0xff]  ;;  %v31_v29 = vld [vmem:[%s253_s1 + $0x88] sm:$0xff]  ;;  %v14_v30 = vld [vmem:[%s253_s1] sm:$0xff] }
  0x14   :  { %55 = vmatpush.msra.mxu0 %v20_v18  ;;  %v30_v31 = vld [vmem:[%s253_s1 + $0x80] sm:$0xff]  ;;  %v13_v33 = vld [vmem:[%s252_s0 + $0x8] sm:$0xff]  ;;  %s95_s1 = sshll.u32 %s254_s2, 4  ;;  %s96_s1 = int_to_ptr.hbm [resolvable:$true] %s95_s1 }
  0x15   :  { %75 = vmatpush.msra.mxu1 %v36_v19  ;;  %v12_v32 = vld [vmem:[%s252_s0] sm:$0xff] }
  0x16   :  { %56 = vmatpush.msra.mxu0 %v19_v20 }
  0x17   :  { %76 = vmatpush.msra.mxu1 %v35_v21 }
  0x18   :  { %57 = vmatpush.msra.mxu0 %v18_v22 }
  0x19   :  { %77 = vmatpush.msra.mxu1 %v34_v23 }
  0x1a   :  { %58 = vmatpush.msra.mxu0 %v17_v24 }
  0x1b   :  { %78 = vmatpush.msra.mxu1 %v33_v25 }
  0x1c   :  { %59 = vmatpush.msra.mxu0 %v16_v26 }
  0x1d   :  { %79 = vmatpush.msra.mxu1 %v32_v27 }
  0x1e   :  { %60 = vmatpush.msra.mxu0 %v15_v28 }
  0x1f   :  { %80 = vmatpush.msra.mxu1 %v31_v29 }
  0x20   :  { %61 = vmatpush.msra.mxu0 %v14_v30 }
  0x21   :  { %81 = vmatpush.msra.mxu1 %v30_v31  ;;  %62 = vmatmul.f32.vlgmr.msra.gmra.mxu0 %v12_v32 }
  0x22   :  { %82 = vmatmul.f32.vlgmr.msra.gmra.mxu1 %v13_v33 }
  0x9e   :  { %v63_v34 = vpop.f32.mrf.mxu0 }
  0x9f   :  { %v83_v35 = vpop.f32.mrf.mxu1 }
  0xa0   :  { %v84_v36 = vadd.f32 %v83_v35, %v63_v34 }
  0xa2   :  { %87 = vst.msk [vmem:[#allocation2] sm:$0xff] %vm86_vm0, %v84_v36 }
  0xa3   :  { %98 = dma.vmem_to_hbm [thread:$0]  %s94_s22, 128, %s96_s1, [#allocation3]  }
  0xa4   :  { %129 = dma.done.wait [#allocation3], 128  }
  0xa5   :  { %130 = vsyncadd [#allocation3], 4294967168 }
  0xa6   :  { %103 = vsyncpa [#allocation3], 1 }

</bundles_post_ra>
